<compile_context>
chip_gen: v7x
topology: tpu7x:2x2x1
jax: 0.10.0
libtpu: 0.0.40
codegen_flags: <defaults>
</compile_context>

<pallas_src>
import functools
import math

import jax
import jax.numpy as jnp
from jax.experimental import pallas as pl
from jax.experimental.pallas import tpu as pltpu

_LOG2E = 1.4426950408889634


def _ceil_to(x, m):
    return -(-x // m) * m


def _pick_seq_block(dim, target, align=8):
    """Return (block, padded_dim).

    Full dim when small; otherwise the largest align-multiple in
    [target/2, target] that divides the align-padded dim; otherwise `target`
    with a (< target) zero-padded tail that is masked in-kernel.
    """
    target = max(align, (target // align) * align)
    if dim <= target:
        return dim, dim
    padded = _ceil_to(dim, align)
    for cand in range(target, max(target // 2, align) - 1, -align):
        if padded % cand == 0:
            return cand, padded
    return target, _ceil_to(dim, target)


def _pick_head_block(h, target):
    """Largest divisor of h that is <= target (no head padding needed)."""
    return max(d for d in range(1, min(target, h) + 1) if h % d == 0)


def _flash_attention_kernel(mask_ref, q_ref, k_ref, v_ref, o_ref,
                            qs_sc, m_sc, l_sc, acc_sc, *,
                            scale_log2e, kv_len, kv_tail, low_prec_exp,
                            approx_recip):
    b = pl.program_id(0)          # batch index (per-batch mask)
    ki = pl.program_id(3)         # Sk reduction step (innermost, "arbitrary")
    bk = v_ref.shape[1]

    is_masked = mask_ref[b] != 0

    @pl.when(ki == 0)
    def _init():
        m_sc[...] = jnp.full_like(m_sc, -jnp.inf)
        l_sc[...] = jnp.zeros_like(l_sc)
        acc_sc[...] = jnp.zeros_like(acc_sc)
        # Fold 1/sqrt(D)*log2(e) into Q once per Q tile (hoisted out of the
        # ki loop): scales bq*D elements instead of bq*Sk scores.
        qs_sc[...] = q_ref[...] * jnp.asarray(scale_log2e, dtype=q_ref.dtype)

    @pl.when(jnp.logical_not(is_masked))
    def _unmasked():
        k = k_ref[...]                                            # (bh, bk, D)
        # Q @ K^T batched over heads, contracting D; no explicit K transpose.
        s = jax.lax.dot_general(
            qs_sc[...], k,
            dimension_numbers=(((2,), (2,)), ((0,), (0,))),
            preferred_element_type=jnp.float32)                   # (bh, bq, bk)

        if kv_tail:  # static: Sk was zero-padded -> mask the ragged key tail
            kidx = ki * bk + jax.lax.broadcasted_iota(jnp.int32, (1, 1, bk), 2)
            s = jnp.where(kidx < kv_len, s, -jnp.inf)

        # Online (streaming) softmax in the log2 domain.
        m_prev = m_sc[...]
        m_new = jnp.maximum(m_prev, jnp.max(s, axis=-1, keepdims=True))
        alpha = jnp.exp2(m_prev - m_new)
        x = s - m_new
        if low_prec_exp:   # static: bf16 exp ~2x EUP throughput on v6e/v7x
            p = jnp.exp2(x.astype(jnp.bfloat16))
        else:
            p = jnp.exp2(x)
        l_sc[...] = alpha * l_sc[...] + jnp.sum(
            p, axis=-1, keepdims=True, dtype=jnp.float32)

        # P @ V batched over heads, MXU in V's native dtype, f32 accumulate.
        pv = jax.lax.dot_general(
            p.astype(v_ref.dtype), v_ref[...],
            dimension_numbers=(((2,), (1,)), ((0,), (0,))),
            preferred_element_type=jnp.float32)                   # (bh, bq, Dv)
        acc_sc[...] = alpha * acc_sc[...] + pv
        m_sc[...] = m_new

    @pl.when(is_masked)
    def _masked():
        # masked_fill(-1e9) over the whole batch element => softmax is uniform
        # over the kv_len true keys => output is mean(V). Skip the MXU matmuls
        # and the exps; accumulate sum(V) (padded rows are zero) and the count.
        vsum = jnp.sum(v_ref[...], axis=1, keepdims=True, dtype=jnp.float32)
        acc_sc[...] = acc_sc[...] + vsum                          # bcast over bq
        if kv_tail:
            valid = jnp.minimum(bk, kv_len - ki * bk).astype(jnp.float32)
        else:
            valid = jnp.float32(bk)
        l_sc[...] = l_sc[...] + valid

    @pl.when(ki == pl.num_programs(3) - 1)
    def _finalize():
        if approx_recip:   # static: approx reciprocal (EUP) for low-prec output
            o = acc_sc[...] * pl.reciprocal(l_sc[...], approx=True)
        else:              # exact division for f32 outputs
            o = acc_sc[...] / l_sc[...]
        o_ref[...] = o.astype(o_ref.dtype)


def calculate_attention(Q, K, V, mask=None, *,
                        block_q=512, block_k=256, block_h=4,
                        vmem_limit_bytes=40 * 1024 * 1024):
    """Pallas equivalent of CalculateAttention.forward(Q, K, V, mask)."""
    B, H, Sq, D = Q.shape
    Sk = K.shape[2]
    Dv = V.shape[3]
    out_dtype = Q.dtype

    bh = _pick_head_block(H, block_h)
    bq, sq_pad = _pick_seq_block(Sq, block_q)
    bk, sk_pad = _pick_seq_block(Sk, block_k)

    # Zero-pad ragged sequence dims. Padded Q rows are sliced off the output;
    # padded K/V rows are masked to -inf inside the kernel.
    if sq_pad != Sq:
        Q = jnp.pad(Q, ((0, 0), (0, 0), (0, sq_pad - Sq), (0, 0)))
    if sk_pad != Sk:
        K = jnp.pad(K, ((0, 0), (0, 0), (0, sk_pad - Sk), (0, 0)))
        V = jnp.pad(V, ((0, 0), (0, 0), (0, sk_pad - Sk), (0, 0)))

    if mask is None:
        mask_i32 = jnp.zeros((B,), jnp.int32)
    else:
        mask_i32 = jnp.asarray(mask).reshape(B).astype(jnp.int32)

    kernel = functools.partial(
        _flash_attention_kernel,
        scale_log2e=_LOG2E / math.sqrt(D),
        kv_len=Sk,
        kv_tail=(sk_pad != Sk),
        low_prec_exp=(jnp.dtype(V.dtype) == jnp.dtype(jnp.bfloat16)),
        approx_recip=(jnp.dtype(out_dtype) != jnp.dtype(jnp.float32)),
    )

    grid = (B, H // bh, sq_pad // bq, sk_pad // bk)

    itemsize = jnp.dtype(Q.dtype).itemsize
    n_q_blocks = sq_pad // bq
    cost = pl.CostEstimate(
        flops=2 * B * H * sq_pad * sk_pad * (D + Dv),
        transcendentals=B * H * sq_pad * sk_pad,
        bytes_accessed=itemsize * (Q.size + (K.size + V.size) * n_q_blocks
                                   + B * H * sq_pad * Dv),
    )

    # TODO(synk): for Dv < 128, a lane-dense [B, Sq, H*Dv] output layout would
    # avoid masked partial stores; it needs an in-kernel (bh,bq,Dv)->(bq,bh*Dv)
    # relayout at finalize, so the module's native [B,H,Sq,Dv] layout is kept
    # (the store happens only once per Sk sweep, so it is off the hot loop).
    out = pl.pallas_call(
        kernel,
        out_shape=jax.ShapeDtypeStruct((B, H, sq_pad, Dv), out_dtype),
        grid_spec=pltpu.PrefetchScalarGridSpec(
            num_scalar_prefetch=1,            # per-batch mask lives in SMEM
            grid=grid,
            in_specs=[
                pl.BlockSpec((None, bh, bq, D),
                             lambda b, h, qi, ki, msk: (b, h, qi, 0)),
                pl.BlockSpec((None, bh, bk, D),
                             lambda b, h, qi, ki, msk: (b, h, ki, 0)),
                pl.BlockSpec((None, bh, bk, Dv),
                             lambda b, h, qi, ki, msk: (b, h, ki, 0)),
            ],
            out_specs=pl.BlockSpec((None, bh, bq, Dv),
                                   lambda b, h, qi, ki, msk: (b, h, qi, 0)),
            scratch_shapes=[
                pltpu.VMEM((bh, bq, D), Q.dtype),        # scale-folded Q tile
                pltpu.VMEM((bh, bq, 1), jnp.float32),    # running max (log2)
                pltpu.VMEM((bh, bq, 1), jnp.float32),    # running sum
                pltpu.VMEM((bh, bq, Dv), jnp.float32),   # output accumulator
            ],
        ),
        compiler_params=pltpu.CompilerParams(
            dimension_semantics=("parallel", "parallel", "parallel",
                                 "arbitrary"),
            vmem_limit_bytes=vmem_limit_bytes,
        ),
        cost_estimate=cost,
    )(mask_i32, Q, K, V)

    if sq_pad != Sq:
        out = out[:, :, :Sq, :]
    return out


def _reference_attention(Q, K, V, mask=None):
    scores = jnp.einsum("bhqd,bhkd->bhqk", Q, K)
    if mask is not None:
        scores = jnp.where(jnp.asarray(mask).reshape(-1, 1, 1, 1) != 0,
                           -1.0e9, scores)
    p = jax.nn.softmax(scores / math.sqrt(Q.shape[-1]), axis=-1)
    return jnp.einsum("bhqk,bhkd->bhqd", p, V)


if __name__ == "__main__":
    B, H, S, D = 2, 4, 8, 32
    key = jax.random.PRNGKey(0)
    kq, kk, kv = jax.random.split(key, 3)
    Q = jax.random.normal(kq, (B, H, S, D), dtype=jnp.float32)
    K = jax.random.normal(kk, (B, H, S, D), dtype=jnp.float32)
    V = jax.random.normal(kv, (B, H, S, D), dtype=jnp.float32)

    # Case 1: no mask.
    out = jax.block_until_ready(calculate_attention(Q, K, V))
    ref = _reference_attention(Q, K, V)
    assert jnp.allclose(out, ref, atol=2e-3, rtol=2e-3), "mismatch (no mask)"

    # Case 2: per-batch mask (batch 1 fully masked -> uniform attention there).
    mask = jnp.array([0, 1], dtype=jnp.bool_)
    out_m = jax.block_until_ready(calculate_attention(Q, K, V, mask))
    ref_m = _reference_attention(Q, K, V, mask)
    assert jnp.allclose(out_m, ref_m, atol=2e-3, rtol=2e-3), "mismatch (mask)"

    # Case 3: ragged Sq/Sk with small blocks (exercises padding + tail masking
    # + the masked-batch valid-key counting).
    S2 = 20
    kq2, kk2, kv2 = jax.random.split(jax.random.PRNGKey(1), 3)
    Q2 = jax.random.normal(kq2, (B, H, S2, D), dtype=jnp.float32)
    K2 = jax.random.normal(kk2, (B, H, S2, D), dtype=jnp.float32)
    V2 = jax.random.normal(kv2, (B, H, S2, D), dtype=jnp.float32)
    out2 = jax.block_until_ready(
        calculate_attention(Q2, K2, V2, mask, block_q=16, block_k=16))
    ref2 = _reference_attention(Q2, K2, V2, mask)
    assert jnp.allclose(out2, ref2, atol=2e-3, rtol=2e-3), "mismatch (ragged)"

    # Case 4: bf16 inputs (exercises the low-precision exp / approx-recip path).
    Qb, Kb, Vb = (x.astype(jnp.bfloat16) for x in (Q, K, V))
    out_b = jax.block_until_ready(calculate_attention(Qb, Kb, Vb))
    ref_b = _reference_attention(Qb.astype(jnp.float32),
                                 Kb.astype(jnp.float32),
                                 Vb.astype(jnp.float32))
    assert jnp.allclose(out_b.astype(jnp.float32), ref_b,
                        atol=3e-2, rtol=3e-2), "mismatch (bf16)"

    print("KERNEL_OK")
</pallas_src>

<mosaic_0001>
module attributes {stable_mosaic.version = 11 : i64} {
  func.func @_flash_attention_kernel(%arg0: i32, %arg1: i32, %arg2: i32, %arg3: i32, %arg4: memref<2xi32, #tpu.memory_space<smem>>, %arg5: memref<1x4x8x32xf32, #tpu.memory_space<vmem>>, %arg6: memref<1x4x8x32xf32, #tpu.memory_space<vmem>>, %arg7: memref<1x4x8x32xf32, #tpu.memory_space<vmem>>, %arg8: memref<1x4x8x32xf32, #tpu.memory_space<vmem>>, %arg9: memref<4x8x32xf32, #tpu.memory_space<vmem>>, %arg10: memref<4x8x1xf32, #tpu.memory_space<vmem>>, %arg11: memref<4x8x1xf32, #tpu.memory_space<vmem>>, %arg12: memref<4x8x32xf32, #tpu.memory_space<vmem>>) attributes {dimension_semantics = [#tpu.dimension_semantics<parallel>, #tpu.dimension_semantics<parallel>, #tpu.dimension_semantics<parallel>, #tpu.dimension_semantics<arbitrary>], iteration_bounds = array<i64: 2, 1, 1, 1>, scalar_prefetch = 1 : i64, scratch_operands = 4 : i64, tpu.core_type = #tpu.core_type<tc>, window_params = [{transform_indices = @transform_0, window_bounds = array<i64: 1, 4, 8, 32>}, {transform_indices = @transform_1, window_bounds = array<i64: 1, 4, 8, 32>}, {transform_indices = @transform_2, window_bounds = array<i64: 1, 4, 8, 32>}, {transform_indices = @transform_3, window_bounds = array<i64: 1, 4, 8, 32>}]} {
    %0 = arith.index_cast %arg0 : i32 to index
    %1 = memref.load %arg4[%0] : memref<2xi32, #tpu.memory_space<smem>>
    %c0_i32 = arith.constant 0 : i32
    %2 = arith.cmpi ne, %1, %c0_i32 : i32
    %c0_i32_0 = arith.constant 0 : i32
    %3 = arith.cmpi eq, %arg3, %c0_i32_0 : i32
    %4 = arith.extui %3 : i1 to i32
    %c0_i32_1 = arith.constant 0 : i32
    %5 = arith.cmpi ne, %4, %c0_i32_1 : i32
    scf.if %5 {
      %cst = arith.constant 0xFF800000 : f32
      %14 = vector.broadcast %cst : f32 to vector<4x8x1xf32>
      %c0 = arith.constant 0 : index
      %c0_6 = arith.constant 0 : index
      %c0_7 = arith.constant 0 : index
      %15 = vector.load %arg10[%c0, %c0_6, %c0_7] : memref<4x8x1xf32, #tpu.memory_space<vmem>>, vector<4x8x1xf32>
      tpu.vector_store %arg10[%c0, %c0_6, %c0_7], %14 {strides = array<i32>} : memref<4x8x1xf32, #tpu.memory_space<vmem>>, vector<4x8x1xf32>,
      %cst_8 = arith.constant 0.000000e+00 : f32
      %16 = vector.broadcast %cst_8 : f32 to vector<4x8x1xf32>
      %c0_9 = arith.constant 0 : index
      %c0_10 = arith.constant 0 : index
      %c0_11 = arith.constant 0 : index
      %17 = vector.load %arg11[%c0_9, %c0_10, %c0_11] : memref<4x8x1xf32, #tpu.memory_space<vmem>>, vector<4x8x1xf32>
      tpu.vector_store %arg11[%c0_9, %c0_10, %c0_11], %16 {strides = array<i32>} : memref<4x8x1xf32, #tpu.memory_space<vmem>>, vector<4x8x1xf32>,
      %cst_12 = arith.constant 0.000000e+00 : f32
      %18 = vector.broadcast %cst_12 : f32 to vector<4x8x32xf32>
      %c0_13 = arith.constant 0 : index
      %c0_14 = arith.constant 0 : index
      %c0_15 = arith.constant 0 : index
      %19 = vector.load %arg12[%c0_13, %c0_14, %c0_15] : memref<4x8x32xf32, #tpu.memory_space<vmem>>, vector<4x8x32xf32>
      tpu.vector_store %arg12[%c0_13, %c0_14, %c0_15], %18 {strides = array<i32>} : memref<4x8x32xf32, #tpu.memory_space<vmem>>, vector<4x8x32xf32>,
      %c0_16 = arith.constant 0 : index
      %c0_17 = arith.constant 0 : index
      %c0_18 = arith.constant 0 : index
      %c0_19 = arith.constant 0 : index
      %20 = vector.load %arg5[%c0_16, %c0_17, %c0_18, %c0_19] : memref<1x4x8x32xf32, #tpu.memory_space<vmem>>, vector<1x4x8x32xf32>
      %21 = vector.shape_cast %20 : vector<1x4x8x32xf32> to vector<4x8x32xf32>
      %cst_20 = arith.constant 0.255034864 : f32
      %22 = vector.broadcast %cst_20 : f32 to vector<4x8x32xf32>
      %23 = arith.mulf %21, %22 : vector<4x8x32xf32>
      %c0_21 = arith.constant 0 : index
      %c0_22 = arith.constant 0 : index
      %c0_23 = arith.constant 0 : index
      %24 = vector.load %arg9[%c0_21, %c0_22, %c0_23] : memref<4x8x32xf32, #tpu.memory_space<vmem>>, vector<4x8x32xf32>
      tpu.vector_store %arg9[%c0_21, %c0_22, %c0_23], %23 {strides = array<i32>} : memref<4x8x32xf32, #tpu.memory_space<vmem>>, vector<4x8x32xf32>,
    } else {
    }
    %true = arith.constant true
    %6 = arith.xori %2, %true : i1
    %7 = arith.extui %6 : i1 to i32
    %c0_i32_2 = arith.constant 0 : i32
    %8 = arith.cmpi ne, %7, %c0_i32_2 : i32
    scf.if %8 {
      %c0 = arith.constant 0 : index
      %c0_6 = arith.constant 0 : index
      %c0_7 = arith.constant 0 : index
      %c0_8 = arith.constant 0 : index
      %14 = vector.load %arg6[%c0, %c0_6, %c0_7, %c0_8] : memref<1x4x8x32xf32, #tpu.memory_space<vmem>>, vector<1x4x8x32xf32>
      %15 = vector.shape_cast %14 : vector<1x4x8x32xf32> to vector<4x8x32xf32>
      %c0_9 = arith.constant 0 : index
      %c0_10 = arith.constant 0 : index
      %c0_11 = arith.constant 0 : index
      %16 = vector.load %arg9[%c0_9, %c0_10, %c0_11] : memref<4x8x32xf32, #tpu.memory_space<vmem>>, vector<4x8x32xf32>
      %cst = arith.constant dense<0.000000e+00> : vector<4x8x8xf32>
      %17 = tpu.matmul %16, %15, %cst {dimension_numbers = #tpu.dot_dimension_numbers<[2], [2], [1], [1], [0, 0, 0, 1, 1, 1], [0], [0]>} : vector<4x8x32xf32>, vector<4x8x32xf32>, vector<4x8x8xf32> -> vector<4x8x8xf32>
      %c0_12 = arith.constant 0 : index
      %c0_13 = arith.constant 0 : index
      %c0_14 = arith.constant 0 : index
      %18 = vector.load %arg10[%c0_12, %c0_13, %c0_14] : memref<4x8x1xf32, #tpu.memory_space<vmem>>, vector<4x8x1xf32>
      %cst_15 = arith.constant dense<0xFF800000> : vector<4x8xf32>
      %19 = vector.multi_reduction <maximumf>, %17, %cst_15 [2] : vector<4x8x8xf32> to vector<4x8xf32>
      %20 = vector.shape_cast %19 : vector<4x8xf32> to vector<4x8x1xf32>
      %21 = arith.maximumf %18, %20 : vector<4x8x1xf32>
      %22 = arith.subf %18, %21 : vector<4x8x1xf32>
      %23 = math.exp2 %22 : vector<4x8x1xf32>
      %24 = vector.broadcast %21 : vector<4x8x1xf32> to vector<4x8x8xf32>
      %25 = arith.subf %17, %24 : vector<4x8x8xf32>
      %26 = math.exp2 %25 : vector<4x8x8xf32>
      %c0_16 = arith.constant 0 : index
      %c0_17 = arith.constant 0 : index
      %c0_18 = arith.constant 0 : index
      %27 = vector.load %arg11[%c0_16, %c0_17, %c0_18] : memref<4x8x1xf32, #tpu.memory_space<vmem>>, vector<4x8x1xf32>
      %28 = arith.mulf %23, %27 : vector<4x8x1xf32>
      %cst_19 = arith.constant dense<0.000000e+00> : vector<4x8xf32>
      %29 = vector.multi_reduction <add>, %26, %cst_19 [2] : vector<4x8x8xf32> to vector<4x8xf32>
      %30 = vector.shape_cast %29 : vector<4x8xf32> to vector<4x8x1xf32>
      %31 = arith.addf %28, %30 : vector<4x8x1xf32>
      %c0_20 = arith.constant 0 : index
      %c0_21 = arith.constant 0 : index
      %c0_22 = arith.constant 0 : index
      %32 = vector.load %arg11[%c0_20, %c0_21, %c0_22] : memref<4x8x1xf32, #tpu.memory_space<vmem>>, vector<4x8x1xf32>
      tpu.vector_store %arg11[%c0_20, %c0_21, %c0_22], %31 {strides = array<i32>} : memref<4x8x1xf32, #tpu.memory_space<vmem>>, vector<4x8x1xf32>,
      %c0_23 = arith.constant 0 : index
      %c0_24 = arith.constant 0 : index
      %c0_25 = arith.constant 0 : index
      %c0_26 = arith.constant 0 : index
      %33 = vector.load %arg7[%c0_23, %c0_24, %c0_25, %c0_26] : memref<1x4x8x32xf32, #tpu.memory_space<vmem>>, vector<1x4x8x32xf32>
      %34 = vector.shape_cast %33 : vector<1x4x8x32xf32> to vector<4x8x32xf32>
      %cst_27 = arith.constant dense<0.000000e+00> : vector<4x8x32xf32>
      %35 = tpu.matmul %26, %34, %cst_27 {dimension_numbers = #tpu.dot_dimension_numbers<[2], [1], [1], [2], [0, 0, 0, 1, 1, 2], [0], [0]>} : vector<4x8x8xf32>, vector<4x8x32xf32>, vector<4x8x32xf32> -> vector<4x8x32xf32>
      %c0_28 = arith.constant 0 : index
      %c0_29 = arith.constant 0 : index
      %c0_30 = arith.constant 0 : index
      %36 = vector.load %arg12[%c0_28, %c0_29, %c0_30] : memref<4x8x32xf32, #tpu.memory_space<vmem>>, vector<4x8x32xf32>
      %37 = vector.broadcast %23 : vector<4x8x1xf32> to vector<4x8x32xf32>
      %38 = arith.mulf %37, %36 : vector<4x8x32xf32>
      %39 = arith.addf %38, %35 : vector<4x8x32xf32>
      %c0_31 = arith.constant 0 : index
      %c0_32 = arith.constant 0 : index
      %c0_33 = arith.constant 0 : index
      %40 = vector.load %arg12[%c0_31, %c0_32, %c0_33] : memref<4x8x32xf32, #tpu.memory_space<vmem>>, vector<4x8x32xf32>
      tpu.vector_store %arg12[%c0_31, %c0_32, %c0_33], %39 {strides = array<i32>} : memref<4x8x32xf32, #tpu.memory_space<vmem>>, vector<4x8x32xf32>,
      %c0_34 = arith.constant 0 : index
      %c0_35 = arith.constant 0 : index
      %c0_36 = arith.constant 0 : index
      %41 = vector.load %arg10[%c0_34, %c0_35, %c0_36] : memref<4x8x1xf32, #tpu.memory_space<vmem>>, vector<4x8x1xf32>
      tpu.vector_store %arg10[%c0_34, %c0_35, %c0_36], %21 {strides = array<i32>} : memref<4x8x1xf32, #tpu.memory_space<vmem>>, vector<4x8x1xf32>,
    } else {
    }
    %9 = arith.extui %2 : i1 to i32
    %c0_i32_3 = arith.constant 0 : i32
    %10 = arith.cmpi ne, %9, %c0_i32_3 : i32
    scf.if %10 {
      %c0 = arith.constant 0 : index
      %c0_6 = arith.constant 0 : index
      %c0_7 = arith.constant 0 : index
      %c0_8 = arith.constant 0 : index
      %14 = vector.load %arg7[%c0, %c0_6, %c0_7, %c0_8] : memref<1x4x8x32xf32, #tpu.memory_space<vmem>>, vector<1x4x8x32xf32>
      %15 = vector.shape_cast %14 : vector<1x4x8x32xf32> to vector<4x8x32xf32>
      %cst = arith.constant dense<0.000000e+00> : vector<4x32xf32>
      %16 = vector.multi_reduction <add>, %15, %cst [1] : vector<4x8x32xf32> to vector<4x32xf32>
      %17 = vector.shape_cast %16 : vector<4x32xf32> to vector<4x1x32xf32>
      %c0_9 = arith.constant 0 : index
      %c0_10 = arith.constant 0 : index
      %c0_11 = arith.constant 0 : index
      %18 = vector.load %arg12[%c0_9, %c0_10, %c0_11] : memref<4x8x32xf32, #tpu.memory_space<vmem>>, vector<4x8x32xf32>
      %19 = vector.broadcast %17 : vector<4x1x32xf32> to vector<4x8x32xf32>
      %20 = arith.addf %18, %19 : vector<4x8x32xf32>
      %c0_12 = arith.constant 0 : index
      %c0_13 = arith.constant 0 : index
      %c0_14 = arith.constant 0 : index
      %21 = vector.load %arg12[%c0_12, %c0_13, %c0_14] : memref<4x8x32xf32, #tpu.memory_space<vmem>>, vector<4x8x32xf32>
      tpu.vector_store %arg12[%c0_12, %c0_13, %c0_14], %20 {strides = array<i32>} : memref<4x8x32xf32, #tpu.memory_space<vmem>>, vector<4x8x32xf32>,
      %c0_15 = arith.constant 0 : index
      %c0_16 = arith.constant 0 : index
      %c0_17 = arith.constant 0 : index
      %22 = vector.load %arg11[%c0_15, %c0_16, %c0_17] : memref<4x8x1xf32, #tpu.memory_space<vmem>>, vector<4x8x1xf32>
      %cst_18 = arith.constant 8.000000e+00 : f32
      %23 = vector.broadcast %cst_18 : f32 to vector<4x8x1xf32>
      %24 = arith.addf %22, %23 : vector<4x8x1xf32>
      %c0_19 = arith.constant 0 : index
      %c0_20 = arith.constant 0 : index
      %c0_21 = arith.constant 0 : index
      %25 = vector.load %arg11[%c0_19, %c0_20, %c0_21] : memref<4x8x1xf32, #tpu.memory_space<vmem>>, vector<4x8x1xf32>
      tpu.vector_store %arg11[%c0_19, %c0_20, %c0_21], %24 {strides = array<i32>} : memref<4x8x1xf32, #tpu.memory_space<vmem>>, vector<4x8x1xf32>,
    } else {
    }
    %c0_i32_4 = arith.constant 0 : i32
    %11 = arith.cmpi eq, %arg3, %c0_i32_4 : i32
    %12 = arith.extui %11 : i1 to i32
    %c0_i32_5 = arith.constant 0 : i32
    %13 = arith.cmpi ne, %12, %c0_i32_5 : i32
    scf.if %13 {
      %c0 = arith.constant 0 : index
      %c0_6 = arith.constant 0 : index
      %c0_7 = arith.constant 0 : index
      %14 = vector.load %arg12[%c0, %c0_6, %c0_7] : memref<4x8x32xf32, #tpu.memory_space<vmem>>, vector<4x8x32xf32>
      %c0_8 = arith.constant 0 : index
      %c0_9 = arith.constant 0 : index
      %c0_10 = arith.constant 0 : index
      %15 = vector.load %arg11[%c0_8, %c0_9, %c0_10] : memref<4x8x1xf32, #tpu.memory_space<vmem>>, vector<4x8x1xf32>
      %16 = vector.broadcast %15 : vector<4x8x1xf32> to vector<4x8x32xf32>
      %17 = arith.divf %14, %16 : vector<4x8x32xf32>
      %c0_11 = arith.constant 0 : index
      %c0_12 = arith.constant 0 : index
      %c0_13 = arith.constant 0 : index
      %c0_14 = arith.constant 0 : index
      %18 = vector.load %arg8[%c0_11, %c0_12, %c0_13, %c0_14] : memref<1x4x8x32xf32, #tpu.memory_space<vmem>>, vector<1x4x8x32xf32>
      %19 = vector.shape_cast %18 : vector<1x4x8x32xf32> to vector<4x8x32xf32>
      %20 = vector.shape_cast %17 : vector<4x8x32xf32> to vector<1x4x8x32xf32>
      tpu.vector_store %arg8[%c0_11, %c0_12, %c0_13, %c0_14], %20 {strides = array<i32>} : memref<1x4x8x32xf32, #tpu.memory_space<vmem>>, vector<1x4x8x32xf32>,
    } else {
    }
    return
  }
  func.func @transform_0(%arg0: i32, %arg1: i32, %arg2: i32, %arg3: i32, %arg4: memref<2xi32, #tpu.memory_space<smem>>) -> (i32, i32, i32, i32) {
    %c0_i32 = arith.constant 0 : i32
    %c0_i32_0 = arith.constant 0 : i32
    return %arg0, %arg1, %arg2, %c0_i32 : i32, i32, i32, i32
  }
  func.func @transform_1(%arg0: i32, %arg1: i32, %arg2: i32, %arg3: i32, %arg4: memref<2xi32, #tpu.memory_space<smem>>) -> (i32, i32, i32, i32) {
    %c0_i32 = arith.constant 0 : i32
    %c0_i32_0 = arith.constant 0 : i32
    return %arg0, %arg1, %arg3, %c0_i32 : i32, i32, i32, i32
  }
  func.func @transform_2(%arg0: i32, %arg1: i32, %arg2: i32, %arg3: i32, %arg4: memref<2xi32, #tpu.memory_space<smem>>) -> (i32, i32, i32, i32) {
    %c0_i32 = arith.constant 0 : i32
    %c0_i32_0 = arith.constant 0 : i32
    return %arg0, %arg1, %arg3, %c0_i32 : i32, i32, i32, i32
  }
  func.func @transform_3(%arg0: i32, %arg1: i32, %arg2: i32, %arg3: i32, %arg4: memref<2xi32, #tpu.memory_space<smem>>) -> (i32, i32, i32, i32) {
    %c0_i32 = arith.constant 0 : i32
    %c0_i32_0 = arith.constant 0 : i32
    return %arg0, %arg1, %arg2, %c0_i32 : i32, i32, i32, i32
  }
}

</mosaic_0001>

<bundles_post_ra>
// kernel: tpu_custom_call.1
= control target key start
LH: loop header
LB: loop body
LE: loop exit
PB: predicated region body
PF: predicated region fallthrough
CT: control target
= control target key end

     0   :  { %s2221_s0 = inlined_call_operand.hbm [shape: s32[2], index: 0, kind: input, shape index: {}]   ;;  %s2222_s1 = inlined_call_operand.hbm [shape: f32[2,4,8,32], index: 1, kind: input, shape index: {}]   ;;  %s2223_s2 = inlined_call_operand.hbm [shape: f32[2,4,8,32], index: 2, kind: input, shape index: {}]   ;;  %s2224_s3 = inlined_call_operand.hbm [shape: f32[2,4,8,32], index: 3, kind: input, shape index: {}]   ;;  %s2225_s4 = inlined_call_operand.hbm [shape: f32[2,4,8,32], index: 4, kind: output, shape index: {}]  }
   0x1   :  { %2235 = sst [smem:[#allocation22_spill]] %s2223_s2  ;;  %s1573_s17 = scalar_lea.hbm %s2221_s0, 16 }
   0x2   :  { %p1574_p0 = scmp.ne.s32.totalorder %s2221_s0, %s1573_s17  ;;  %p1577_p1 = scmp.lt.u32.totalorder %s1573_s17, %s2221_s0 }
   0x4   :  { %p1579_p2 = pnand %p1577_p1, %p1574_p0 }
   0x6   :  { %1582 = shalt.err (!%p1579_p2)  }
   0x7   :  { %s1763_s22 = smov [#allocation7]  }
   0x8   :  { %10 = dma.hbm_to_smem %s2221_s0, 16, %s1763_s22, [#allocation6] }
   0x9   :  { %1725 = dma.done.wait [#allocation6], 16 }
   0xa   :  { %1726 = vsyncadd [#allocation6], 4294967280 }
   0xb   :  { %12 = sfence }
   0xc   :  { %13 = vsyncpa [#allocation9], 0 }
   0xd   :  { %15 = vsyncpa [#allocation9 + $0x1], 0 }
   0xe   :  { %16 = vsyncpa [#allocation12], 0 }
   0xf   :  { %18 = vsyncpa [#allocation12 + $0x1], 0 }
  0x10   :  { %19 = vsyncpa [#allocation10], 0 }
  0x11   :  { %21 = vsyncpa [#allocation10 + $0x1], 0  ;;  %s1815_s25 = smov 0   ;;  %s1817_s26 = smov 0  }
  0x12   :  { %s1819_s27 = smov 0   ;;  %s1821_s28 = smov 0  }
  0x13   :  { %s1823_s29 = smov 0   ;;  %s1825_s0 = smov 0  }
  0x14 LB: > { %2236 = sst [smem:[#allocation19_spill]] %s1757_s29  ;;  %s1846_s30 = sadd.s32 4294967295, %s1761_s0   ;;  %s1761_s0 = sphi %s1825_s0, %s27_s0   ;;  %s1757_s29 = sphi %s1823_s29, %s2259_s29   ;;  %s1753_s28 = sphi %s1821_s28, %s2258_s28   ;;  %s1749_s27 = sphi %s1819_s27, %s2262_s27   ;;  %s1745_s26 = sphi %s1817_s26, %s2261_s26   ;;  %s1741_s25 = sphi %s1815_s25, %s2260_s25  }
  0x15   : > { %s1366_s5 = sadd.s32 4294967294, %s1761_s0   ;;  %s53_s6 = sadd.s32 1, %s1757_s29 }
  0x16   : > { %s64_s7 = sadd.s32 1, %s1749_s27  ;;  %p55_p3 = scmp.ge.s32.totalorder %s53_s6, 2 }
  0x17   : > { %p71_p4 = scmp.ne.s32.totalorder %s1749_s27, %s1745_s26  ;;  %p72_p5 = scmp.eq.s32.totalorder %s1761_s0, 0 }
  0x18   : > { %p77_p6 = scmp.ne.s32.totalorder %s1745_s26, %s1741_s25  ;;  %s2264_s6 = smov (%p55_p3, %s53_s6), 0 }
  0x19   : > { %2237 = sst [smem:[#allocation20_spill]] %s2264_s6  ;;  %p1858_p7 = por %p72_p5, %p71_p4 }
  0x1a   : > { %p78_p8 = scmp.eq.s32.totalorder %s1846_s30, 0  ;;  %s57_s9 = ssub.s32 %s1757_s29, %s2264_s6 }
  0x1b   : > { %p165_p9 = scmp.eq.s32.totalorder %s1846_s30, 1  ;;  %p62_p10 = scmp.eq.s32.totalorder %s57_s9, 0 }
  0x1c   : > { %p1866_p11 = por %p78_p8, %p77_p6  ;;  %p171_p13 = scmp.eq.s32.totalorder %s1366_s5, 1 }
  0x1d   : > { %p1870_p12 = por %p165_p9, %p71_p4  ;;  %p1484_p2 = scmp.lt.s32.totalorder %s1761_s0, 2 }
  0x1e   : > { %s2239_s10 = scalar_select %p1866_p11, 1, 0 }
  0x1f   : > { %s2240_s11 = scalar_select %p1870_p12, 1, 0 }
  0x20   : > { %s1875_s12 = scalar_select %p62_p10, %s1749_s27, %s64_s7  }
  0x21   : > { %p1877_p0 = por %p171_p13, %p77_p6  ;;  %s2228_s14 = sand.u32 1, %s1749_s27  }
  0x22   : > { %2241 = sst [smem:[#allocation21_spill]] %s1875_s12  ;;  %s1886_s15 = sshll.u32 %s2228_s14, 5 }
  0x23   : > { %s2242_s13 = scalar_select %p1877_p0, 1, 0 }
  0x24   : > { %s1889_s16 = sshll.u32 %s1757_s29, 9  ;;  %p1893_p3 = pnand %p1484_p2, %p1858_p7 }
  0x25   : > { %s215_s18 = sand.u32 1, %s1761_s0   ;;  %s2244_s2 = sld [smem:[#allocation22_spill]] }
  0x26   : > { %s219_s22 = scalar_lea.vmem [#allocation11], %s1886_s15  ;;  %s1909_s24 = scalar_lea.sflag [#allocation12], %s215_s18 }
  0x27   : > { %s229_s23 = sshll.u32 %s219_s22, 4  ;;  %p1915_p7 = pneg %p1893_p3  ;;  %s1906_s23 = int_to_ptr.vmem [resolvable:$true] %s229_s23 }
  0x2b   : > { %s1902_s21 = scalar_lea.hbm %s2244_s2, %s1889_s16  ;;  %s1588_s19 = scalar_lea.hbm %s2244_s2, 1024 }
  0x2c   : > { %s1583_s5 = scalar_lea.hbm %s1902_s21, 512  ;;  %p1589_p10 = scmp.lt.u32.totalorder %s1902_s21, %s2244_s2 }
  0x2d   : > { %p1584_p6 = scmp.ne.s32.totalorder %s1902_s21, %s1583_s5  ;;  %p1590_p13 = scmp.lt.u32.totalorder %s1588_s19, %s1583_s5 }
  0x2e   : > { %p1592_p1 = scmp.lt.u32.totalorder %s1583_s5, %s1902_s21 }
  0x2f   : > { %p1586_p8 = pnand %p1915_p7, %p1584_p6  ;;  %p1591_p2 = por %p1590_p13, %p1589_p10 }
  0x31   : > { %p1587_p9 = pneg %p1586_p8  ;;  %p1593_p4 = por %p1592_p1, %p1591_p2 }
  0x33   : > { %p1594_p5 = pnand %p1593_p4, %p1587_p9 }
  0x35   : > { %1597 = shalt.err (!%p1594_p5)
}
  0x36   : > { %s1598_s18 = scalar_lea.vmem %s1906_s23, 512  ;;  %s1764_s8 = smov [#allocation11]  }
  0x37   : > { %p1599_p6 = scmp.ne.s32.totalorder %s1906_s23, %s1598_s18  ;;  %s1603_s9 = sshll.u32 %s1764_s8, 4  ;;  %s1604_s9 = int_to_ptr.vmem [resolvable:$false] %s1603_s9 }
  0x38   : > { %s1605_s20 = scalar_lea.vmem %s1604_s9, 1024  ;;  %p1606_p12 = scmp.lt.s32.totalorder %s1906_s23, %s1604_s9 }
  0x39   : > { %p1601_p8 = pnand %p1599_p6, %p1915_p7  ;;  %p1607_p11 = scmp.lt.s32.totalorder %s1605_s20, %s1598_s18 }
  0x3b   : > { %p1602_p0 = pneg %p1601_p8  ;;  %p1608_p10 = por %p1607_p11, %p1606_p12 }
  0x3d   : > { %p1609_p13 = pnand %p1608_p10, %p1602_p0 }
  0x3f   : > { %1612 = shalt.err (!%p1609_p13)
}
  0x40   : > { %s2229_s5 = smov 128   ;;  %s2231_s19 = smov 8  }
  0x41   : > { %1476 = dma.hbm_to_vmem [thread:$0]  (!%p1893_p3), %s1902_s21, 512, %s1906_s23, %s1909_s24, %s2229_s5, %s2229_s5, %s2231_s19  }
  0x42   : > { %p2246_p11 = scmp.lt.s32.totalorder %s1761_s0, 3  ;;  %p2247_p12 = scmp.ge.s32.totalorder %s1761_s0, 1 }
  0x43   : > { %s1954_s9 = scalar_lea.hbm %s2222_s1, %s1889_s16  ;;  %s195_s20 = scalar_lea.vmem [#allocation8], %s1886_s15 }
  0x44   : > { %p1946_p0 = pnand %p2247_p12, %p2246_p11  ;;  %s205_s14 = sshll.u32 %s195_s20, 4  ;;  %s1957_s14 = int_to_ptr.vmem [resolvable:$true] %s205_s14 }
  0x45   : > { %s1963_s5 = scalar_lea.hbm %s2224_s3, %s1889_s16  ;;  %s2249_s19 = sand.u32 1, %s1749_s27  }
  0x46   : > { %s2248_s22 = scalar_select %p1946_p0, 1, 0 }
  0x47   : > { %s1967_s2 = scalar_lea.sflag [#allocation9], %s2249_s19  ;;  %s1613_s6 = scalar_lea.hbm %s1954_s9, 512 }
  0x48   : > { %p1614_p1 = scmp.ne.s32.totalorder %s1954_s9, %s1613_s6  ;;  %s1618_s29 = scalar_lea.hbm %s2222_s1, 1024 }
  0x49   : > { %p1619_p9 = scmp.lt.u32.totalorder %s1954_s9, %s2222_s1  ;;  %p1620_p2 = scmp.lt.u32.totalorder %s1618_s29, %s1613_s6 }
  0x4a   : > { %p1616_p4 = pnand %p1614_p1, %p1915_p7  ;;  %p1622_p8 = scmp.lt.u32.totalorder %s1613_s6, %s1954_s9 }
  0x4b   : > { %p1621_p6 = por %p1620_p2, %p1619_p9 }
  0x4c   : > { %p1617_p5 = pneg %p1616_p4 }
  0x4d   : > { %p1623_p10 = por %p1622_p8, %p1621_p6 }
  0x4f   : > { %p1624_p13 = pnand %p1623_p10, %p1617_p5 }
  0x51   : > { %1627 = shalt.err (!%p1624_p13)
}
  0x52   : > { %s1628_s16 = scalar_lea.vmem %s1957_s14, 512  ;;  %s1767_s19 = smov [#allocation8]  }
  0x53   : > { %p1629_p11 = scmp.ne.s32.totalorder %s1957_s14, %s1628_s16  ;;  %s1633_s21 = sshll.u32 %s1767_s19, 4  ;;  %s1634_s21 = int_to_ptr.vmem [resolvable:$false] %s1633_s21 }
  0x54   : > { %s1635_s12 = scalar_lea.vmem %s1634_s21, 1024  ;;  %p1636_p4 = scmp.lt.s32.totalorder %s1957_s14, %s1634_s21 }
  0x55   : > { %p1631_p12 = pnand %p1629_p11, %p1915_p7  ;;  %p1637_p0 = scmp.lt.s32.totalorder %s1635_s12, %s1628_s16 }
  0x57   : > { %p1632_p1 = pneg %p1631_p12  ;;  %p1638_p9 = por %p1637_p0, %p1636_p4 }
  0x59   : > { %p1639_p2 = pnand %p1638_p9, %p1632_p1 }
  0x5b   : > { %1642 = shalt.err (!%p1639_p2)
}
  0x5c   : > { %s2250_s29 = smov 8   ;;  %s2251_s6 = smov 128  }
  0x5d   : > { %1473 = dma.hbm_to_vmem [thread:$0]  (!%p1893_p3), %s1954_s9, 512, %s1957_s14, %s1967_s2, %s2251_s6, %s2251_s6, %s2250_s29  }
  0x5e   : > { %s243_s23 = scalar_lea.vmem [#allocation13], %s1886_s15  ;;  %s1643_s8 = scalar_lea.hbm %s1963_s5, 512 }
  0x5f   : > { %s253_s18 = sshll.u32 %s243_s23, 4  ;;  %p1644_p0 = scmp.ne.s32.totalorder %s1963_s5, %s1643_s8  ;;  %s1995_s18 = int_to_ptr.vmem [resolvable:$true] %s253_s18 }
  0x60   : > { %s1648_s19 = scalar_lea.hbm %s2224_s3, 1024  ;;  %p1649_p8 = scmp.lt.u32.totalorder %s1963_s5, %s2224_s3 }
  0x61   : > { %p1646_p5 = pnand %p1644_p0, %p1915_p7  ;;  %p1650_p10 = scmp.lt.u32.totalorder %s1648_s19, %s1643_s8 }
  0x62   : > { %p1652_p11 = scmp.lt.u32.totalorder %s1643_s8, %s1963_s5 }
  0x63   : > { %p1647_p6 = pneg %p1646_p5  ;;  %p1651_p13 = por %p1650_p10, %p1649_p8 }
  0x65   : > { %p1653_p12 = por %p1652_p11, %p1651_p13 }
  0x67   : > { %p1654_p1 = pnand %p1653_p12, %p1647_p6 }
  0x69   : > { %1657 = shalt.err (!%p1654_p1)
}
  0x6a   : > { %s1658_s2 = scalar_lea.vmem %s1995_s18, 512  ;;  %s1768_s14 = smov [#allocation13]  }
  0x6b   : > { %p1659_p4 = scmp.ne.s32.totalorder %s1995_s18, %s1658_s2  ;;  %s1663_s15 = sshll.u32 %s1768_s14, 4  ;;  %s1664_s15 = int_to_ptr.vmem [resolvable:$false] %s1663_s15 }
  0x6c   : > { %s1665_s9 = scalar_lea.vmem %s1664_s15, 1024  ;;  %p1666_p0 = scmp.lt.s32.totalorder %s1995_s18, %s1664_s15 }
  0x6d   : > { %p1661_p9 = pnand %p1659_p4, %p1915_p7  ;;  %p1667_p5 = scmp.lt.s32.totalorder %s1665_s9, %s1658_s2 }
  0x6f   : > { %p1662_p2 = pneg %p1661_p9  ;;  %p1668_p8 = por %p1667_p5, %p1666_p0 }
  0x71   : > { %p1669_p10 = pnand %p1668_p8, %p1662_p2 }
  0x73   : > { %1672 = shalt.err (!%p1669_p10)
}
  0x74   : > { %1479 = dma.hbm_to_vmem [thread:$0]  (!%p1893_p3), %s1963_s5, 512, %s1995_s18, %s1909_s24, %s2251_s6, %s2251_s6, %s2250_s29  }
  0x75   : > { %p2252_p7 = scmp.ne.s32.totalorder %s2248_s22, 0 }
  0x76   : > { %s2025_s7 = sand.u32 (!%p2252_p7), 1, %s1745_s26   ;;  %p2253_p6 = scmp.ne.s32.totalorder (!%p2252_p7), %s2239_s10, 0 }
  0x77   : > { %265 = sbr.rel (%p2252_p7) target bundleno = 1056 (0x420), region = 32  ;;  %s2028_s23 = sshll.u32 (!%p2252_p7), %s2025_s7, 5 }
  0x78   : > { %s268_s17 = scalar_lea.sflag (!%p2252_p7), [#allocation9], %s2025_s7  ;;  %s2032_s8 = scalar_lea.vmem (!%p2252_p7), [#allocation8], %s2028_s23 }
  0x7e   : > { %1728 = dma.done.wait (%p2253_p6), %s268_s17, 512  }
  0x7f   : > { %1730 = vsyncadd (%p2253_p6), %s268_s17, 4294966784  ;;  %s276_s24 = sand.u32 1, %s1846_s30   ;;  %s2040_s22 = scalar_lea.vmem [#allocation11], %s2028_s23 }
  0x80   : > { %s277_s5 = scalar_lea.sflag [#allocation12], %s276_s24 }
  0x81   : > { %1732 = dma.done.wait (%p2253_p6), %s277_s5, 1024  }
  0x82   : > { %1734 = vsyncadd (%p2253_p6), %s277_s5, 4294966272  ;;  %vm332_vm0 = vcmask 7168   ;;  %s2047_s29 = sld [smem:[#allocation7 + %s1753_s28]]  ;;  %v1769_v0 = vmov -inf   ;;  %v1770_v1 = vmov 0.0   ;;  %vm341_vm1 = vcmask 261120  }
  0x83   : > { %333 = vst.msk [vmem:[#allocation3] sm:$0xff] %vm332_vm0, %v1769_v0  ;;  %334 = vst.msk [vmem:[#allocation3 + $0x8] sm:$0xff] %vm332_vm0, %v1769_v0  ;;  %v346_v2 = vld [vmem:[%s2032_s8] sm:$0xff]  ;;  %v347_v3 = vld [vmem:[%s2032_s8 + $0x8] sm:$0xff]  ;;  %s2070_s30 = scalar_lea.vmem [#allocation13], %s2028_s23  ;;  %s2073_s10 = scalar_lea.vmem [#allocation14], %s2028_s23 }
  0x84   : > { %335 = vst.msk [vmem:[#allocation3 + $0x10] sm:$0xff] %vm332_vm0, %v1769_v0  ;;  %336 = vst.msk [vmem:[#allocation3 + $0x18] sm:$0xff] %vm332_vm0, %v1769_v0  ;;  %v348_v4 = vld [vmem:[%s2032_s8 + $0x10] sm:$0xff]  ;;  %v350_v5 = vmul.f32 0.25503486, %v346_v2  ;;  %v349_v8 = vld [vmem:[%s2032_s8 + $0x18] sm:$0xff] }
  0x85   : > { %337 = vst.msk [vmem:[#allocation4] sm:$0xff] %vm332_vm0, %v1770_v1  ;;  %338 = vst.msk [vmem:[#allocation4 + $0x8] sm:$0xff] %vm332_vm0, %v1770_v1  ;;  %v351_v6 = vmul.f32 0.25503486, %v347_v3  ;;  %v352_v7 = vmul.f32 0.25503486, %v348_v4 }
  0x86   : > { %339 = vst.msk [vmem:[#allocation4 + $0x10] sm:$0xff] %vm332_vm0, %v1770_v1  ;;  %340 = vst.msk [vmem:[#allocation4 + $0x18] sm:$0xff] %vm332_vm0, %v1770_v1  ;;  %v353_v9 = vmul.f32 0.25503486, %v349_v8 }
  0x87   : > { %342 = vst.msk [vmem:[#allocation5] sm:$0xff] %vm341_vm1, %v1770_v1  ;;  %343 = vst.msk [vmem:[#allocation5 + $0x8] sm:$0xff] %vm341_vm1, %v1770_v1 }
  0x88   : > { %344 = vst.msk [vmem:[#allocation5 + $0x10] sm:$0xff] %vm341_vm1, %v1770_v1  ;;  %345 = vst.msk [vmem:[#allocation5 + $0x18] sm:$0xff] %vm341_vm1, %v1770_v1  ;;  %p1383_p3 = scmp.ne.s32.totalorder %s2047_s29, 0 }
  0x89   : > { %354 = vst.msk [vmem:[#allocation2] sm:$0xff] %vm341_vm1, %v350_v5  ;;  %355 = vst.msk [vmem:[#allocation2 + $0x8] sm:$0xff] %vm341_vm1, %v351_v6  ;;  %v362_v10 = vld [vmem:[%s2040_s22] sm:$0xff] (!%p1383_p3)  ;;  %v363_v11 = vld [vmem:[%s2040_s22 + $0x8] sm:$0xff] (!%p1383_p3)  ;;  %v1771_v12 = vmov (!%p1383_p3), 0.0   ;;  %vm1772_vm2 = vmmov (!%p1383_p3), 0  }
  0x8a   : > { %356 = vst.msk [vmem:[#allocation2 + $0x10] sm:$0xff] %vm341_vm1, %v352_v7  ;;  %357 = vst.msk [vmem:[#allocation2 + $0x18] sm:$0xff] %vm341_vm1, %v353_v9  ;;  %361 = sbr.rel (%p1383_p3) target bundleno = 870 (0x366), region = 52  ;;  %1422 = vmatprep.subr.mxu0 (!%p1383_p3), %v1771_v12  ;;  %1424 = vmatprep.mubr.msk.f32.mxu0 (!%p1383_p3), %vm1772_vm2, %v1771_v12  ;;  %v364_v15 = vld [vmem:[%s2040_s22 + $0x10] sm:$0xff] (!%p1383_p3)  ;;  %v365_v16 = vld [vmem:[%s2040_s22 + $0x18] sm:$0xff] (!%p1383_p3)  ;;  %vm679_vm3 = vcmask (!%p1383_p3), 64512  }
  0x8b   : > { %1423 = vmatpush3.xpose.msk.msra.mxu0 (!%p1383_p3), %vm341_vm1, %v362_v10  ;;  %1427 = vmatprep.subr.mxu1 (!%p1383_p3), %v1771_v12  ;;  %v1773_v31 = vmov (!%p1383_p3), 0   ;;  %v675_v32 = vld [vmem:[#allocation3] sm:$0xff] (!%p1383_p3)  ;;  %v676_v35 = vld [vmem:[#allocation3 + $0x8] sm:$0xff] (!%p1383_p3)  ;;  %v677_v36 = vld [vmem:[#allocation3 + $0x10] sm:$0xff] (!%p1383_p3) }
  0x8c   : > { %1428 = vmatpush3.xpose.msk.msra.mxu1 (!%p1383_p3), %vm341_vm1, %v363_v11  ;;  %1429 = vmatprep.mubr.msk.f32.mxu1 (!%p1383_p3), %vm1772_vm2, %v1771_v12  ;;  %v678_v42 = vld [vmem:[#allocation3 + $0x18] sm:$0xff] (!%p1383_p3)  ;;  %v761_v48 = vld [vmem:[%s2070_s30] sm:$0xff] (!%p1383_p3)  ;;  %v762_v50 = vld [vmem:[%s2070_s30 + $0x8] sm:$0xff] (!%p1383_p3) }
  0x8d   : > { %1432 = vmatprep.subr.mxu0 (!%p1383_p3), %v1771_v12  ;;  %1437 = vmatprep.subr.mxu1 (!%p1383_p3), %v1771_v12  ;;  %v763_v58 = vld [vmem:[%s2070_s30 + $0x10] sm:$0xff] (!%p1383_p3)  ;;  %v764_v62 = vld [vmem:[%s2070_s30 + $0x18] sm:$0xff] (!%p1383_p3)  ;;  %v732_v9 = vld [vmem:[#allocation4] sm:$0xff] (!%p1383_p3) }
  0x8e   : > { %1545 = vset.pattern.permute.xlu0 (!%p1383_p3), %v1773_v31  ;;  %1546 = vset.pattern.permute.xlu1 (!%p1383_p3), %v1773_v31 }
  0x90   : > { %v366_v13 = vld [vmem:[#allocation2] sm:$0xff] (!%p1383_p3)  ;;  %v367_v14 = vld [vmem:[#allocation2 + $0x8] sm:$0xff] (!%p1383_p3) }
  0x91   : > { %1425 = vmatmul.mubr.msk.f32.vlgmr.msra.gmra.mrb[0].mxu0 %vm341_vm1, %v366_v13  ;;  %1430 = vmatmul.mubr.msk.f32.vlgmr.msra.gmra.mrb[0].mxu1 %vm341_vm1, %v367_v14  ;;  %v368_v17 = vld [vmem:[#allocation2 + $0x10] sm:$0xff]  ;;  %v369_v18 = vld [vmem:[#allocation2 + $0x18] sm:$0xff] }
  0x92   : > { %1433 = vmatpush3.xpose.msk.msra.mxu0 %vm341_vm1, %v364_v15  ;;  %1434 = vmatprep.mubr.msk.f32.mxu0 %vm1772_vm2, %v1771_v12 }
  0x93   : > { %1438 = vmatpush3.xpose.msk.msra.mxu1 %vm341_vm1, %v365_v16  ;;  %1439 = vmatprep.mubr.msk.f32.mxu1 %vm1772_vm2, %v1771_v12 }
  0x94   : > { %1442 = vmatprep.subr.mxu0 %v1771_v12  ;;  %1447 = vmatprep.subr.mxu1 %v1771_v12 }
  0x95   : > { %1435 = vmatmul.mubr.msk.f32.vlgmr.msra.gmra.mrb[2].mxu0 %vm341_vm1, %v368_v17 }
  0x96   : > { %1440 = vmatmul.mubr.msk.f32.vlgmr.msra.gmra.mrb[2].mxu1 %vm341_vm1, %v369_v18  ;;  %1444 = vmatprep.mubr.msk.f32.mxu0 %vm1772_vm2, %v1771_v12  ;;  %v734_v18 = vld [vmem:[#allocation4 + $0x10] sm:$0xff] }
  0x97   : > { %1449 = vmatprep.mubr.msk.f32.mxu1 %vm1772_vm2, %v1771_v12  ;;  %1443 = vmatpush3.msra.mxu0 %v761_v48 }
  0x98   : > { %1452 = vmatprep.subr.mxu0 %v1771_v12  ;;  %1448 = vmatpush3.msra.mxu1 %v762_v50 }
  0x99   : > { %1457 = vmatprep.subr.mxu1 %v1771_v12 }
 0x164   : > { %v443_v19 = vpop.f32.mrb[0].mxu0  ;;  %v519_v22 = vpop.f32.mrb[0].mxu1 }
 0x165   : > { %v1426_v20 = vpop.f32.mrb[1].mxu0  ;;  %v680_v21 = vsel %vm679_vm3, %v443_v19, -inf  ;;  %v1431_v23 = vpop.f32.mrb[1].mxu1  ;;  %v683_v24 = vsel %vm679_vm3, %v519_v22, -inf }
 0x166   : > { %681 = vmax.xlane.f32.xlu0 %v680_v21  ;;  %v735_v21 = vld [vmem:[#allocation4 + $0x18] sm:$0xff] }
 0x168   : > { %v595_v25 = vpop.f32.mrb[2].mxu0 }
 0x169   : > { %v1436_v26 = vpop.f32.mrb[3].mxu0  ;;  %v686_v27 = vsel %vm679_vm3, %v595_v25, -inf  ;;  %v671_v28 = vpop.f32.mrb[2].mxu1 }
 0x16a   : > { %684 = vmax.xlane.f32.xlu0 %v683_v24  ;;  %687 = vmax.xlane.f32.xlu1 %v686_v27  ;;  %v1441_v29 = vpop.f32.mrb[3].mxu1  ;;  %v689_v30 = vsel %vm679_vm3, %v671_v28, -inf  ;;  %v1057_v26 = vld [vmem:[#allocation5] sm:$0xff] }
 0x16e   : > { %690 = vmax.xlane.f32.xlu1 %v689_v30 }
 0x1f3   : > { %v682_v33 = vpop.xlane.xlu0 %681 }
 0x1f4   : > { %v692_v34 = vmax.f32 %v675_v32, %v682_v33 }
 0x1f6   : > { %1093 = vst.msk [vmem:[#allocation3] sm:$0xff] %vm332_vm0, %v692_v34  ;;  %706 = vperm.xlu0 %1545, %v692_v34   ;;  %v696_v37 = vsub.f32 %v675_v32, %v692_v34  ;;  %v1059_v34 = vld [vmem:[#allocation5 + $0x10] sm:$0xff] }
 0x1f7   : > { %v685_v38 = vpop.xlane.xlu0 %684  ;;  %v688_v39 = vpop.xlane.xlu1 %687 }
 0x1f8   : > { %v693_v40 = vmax.f32 %v676_v35, %v685_v38  ;;  %v694_v41 = vmax.f32 %v677_v36, %v688_v39  ;;  %1547 = vpow2.f32 %v696_v37  ;;  %v1060_v39 = vld [vmem:[#allocation5 + $0x18] sm:$0xff] }
 0x1fa   : > { %v697_v43 = vsub.f32 %v676_v35, %v693_v40  ;;  %1094 = vst.msk [vmem:[#allocation3 + $0x8] sm:$0xff] %vm332_vm0, %v693_v40  ;;  %711 = vperm.xlu1 %1546, %v693_v40   ;;  %v698_v44 = vsub.f32 %v677_v36, %v694_v41  ;;  %1095 = vst.msk [vmem:[#allocation3 + $0x10] sm:$0xff] %vm332_vm0, %v694_v41 }
 0x1fb   : > { %v691_v45 = vpop.xlane.xlu1 %690 }
 0x1fc   : > { %v695_v46 = vmax.f32 %v678_v42, %v691_v45 }
 0x1fe   : > { %716 = vperm.xlu1 %1546, %v694_v41   ;;  %v699_v47 = vsub.f32 %v678_v42, %v695_v46  ;;  %1096 = vst.msk [vmem:[#allocation3 + $0x18] sm:$0xff] %vm332_vm0, %v695_v46 }
 0x202   : > { %721 = vperm.xlu1 %1546, %v695_v46   ;;  %v1548_v49 = vpop.eup %1547 }
 0x203   : > { %v736_v10 = vmul.f32 %v1548_v49, %v732_v9 }
 0x206   : > { %1063 = vperm.xlu1 %1546, %v1548_v49  }
 0x275   : > { %v707_v51 = vpop.permute.xlu0 %706 }
 0x276   : > { %v724_v52 = vsub.f32 %v443_v19, %v707_v51 }
 0x278   : > { %1549 = vpow2.f32 %v724_v52 }
 0x279   : > { %v712_v53 = vpop.permute.xlu1 %711 }
 0x27a   : > { %v725_v54 = vsub.f32 %v519_v22, %v712_v53 }
 0x27c   : > { %1551 = vpow2.f32 %v725_v54 }
 0x27d   : > { %v717_v55 = vpop.permute.xlu1 %716 }
 0x27e   : > { %v726_v56 = vsub.f32 %v595_v25, %v717_v55 }
 0x280   : > { %1553 = vpow2.f32 %v726_v56 }
 0x281   : > { %v722_v57 = vpop.permute.xlu1 %721 }
 0x282   : > { %v1550_v59 = vpop.eup %1549  ;;  %v727_v60 = vsub.f32 %v671_v28, %v722_v57  ;;  %v1058_v28 = vld [vmem:[#allocation5 + $0x8] sm:$0xff] }
 0x283   : > { %1445 = vmatmul.mubr.msk.f32.vlgmr.msra.gmra.mrb[4].mxu0 %vm679_vm3, %v1550_v59  ;;  %v740_v61 = vsel %vm679_vm3, %v1550_v59, 0.0 }
 0x284   : > { %1555 = vpow2.f32 %v727_v60  ;;  %741 = vadd.xlane.f32.xlu1 %v740_v61  ;;  %1453 = vmatpush3.msra.mxu0 %v763_v58 }
 0x285   : > { %1454 = vmatprep.mubr.msk.f32.mxu0 %vm1772_vm2, %v1771_v12  ;;  %1557 = vpow2.f32 %v698_v44  ;;  %v1064_v8 = vpop.permute.xlu1 %1063 }
 0x286   : > { %v1552_v63 = vpop.eup %1551  ;;  %1559 = vpow2.f32 %v697_v43  ;;  %v1081_v27 = vmul.f32 %v1064_v8, %v1057_v26 }
 0x287   : > { %1450 = vmatmul.mubr.msk.f32.vlgmr.msra.gmra.mrb[4].mxu1 %vm679_vm3, %v1552_v63  ;;  %v743_v0 = vsel %vm679_vm3, %v1552_v63, 0.0  ;;  %1561 = vpow2.f32 %v699_v47 }
 0x288   : > { %744 = vadd.xlane.f32.xlu0 %v743_v0  ;;  %1458 = vmatpush3.msra.mxu1 %v764_v62 }
 0x289   : > { %1459 = vmatprep.mubr.msk.f32.mxu1 %vm1772_vm2, %v1771_v12  ;;  %v733_v12 = vld [vmem:[#allocation4 + $0x8] sm:$0xff] }
 0x28a   : > { %v1554_v1 = vpop.eup %1553 }
 0x28b   : > { %1455 = vmatmul.mubr.msk.f32.vlgmr.msra.gmra.mrb[6].mxu0 %vm679_vm3, %v1554_v1  ;;  %v746_v5 = vsel %vm679_vm3, %v1554_v1, 0.0 }
 0x28e   : > { %v1556_v2 = vpop.eup %1555 }
 0x28f   : > { %1460 = vmatmul.mubr.msk.f32.vlgmr.msra.gmra.mrb[6].mxu1 %vm679_vm3, %v1556_v2  ;;  %v1558_v3 = vpop.eup %1557  ;;  %v749_v6 = vsel %vm679_vm3, %v1556_v2, 0.0 }
 0x290   : > { %v1560_v4 = vpop.eup %1559  ;;  %v738_v19 = vmul.f32 %v1558_v3, %v734_v18 }
 0x291   : > { %v1562_v7 = vpop.eup %1561  ;;  %v737_v14 = vmul.f32 %v1560_v4, %v733_v12 }
 0x292   : > { %v739_v23 = vmul.f32 %v1562_v7, %v735_v21 }
 0x295   : > { %1073 = vperm.xlu1 %1546, %v1558_v3  }
 0x29e   : > { %1068 = vperm.xlu0 %1545, %v1560_v4  }
 0x2b9   : > { %747 = vadd.xlane.f32.xlu1 %v746_v5 }
 0x2bd   : > { %750 = vadd.xlane.f32.xlu1 %v749_v6 }
 0x2ce   : > { %1078 = vperm.xlu1 %1546, %v1562_v7  }
 0x311   : > { %v742_v11 = vpop.xlane.xlu1 %741 }
 0x312   : > { %v752_v13 = vadd.f32 %v742_v11, %v736_v10 }
 0x314   : > { %757 = vst.msk [vmem:[#allocation4] sm:$0xff] %vm332_vm0, %v752_v13 }
 0x315   : > { %v745_v15 = vpop.xlane.xlu0 %744  ;;  %v1074_v17 = vpop.permute.xlu1 %1073 }
 0x316   : > { %v753_v16 = vadd.f32 %v745_v15, %v737_v14  ;;  %v1083_v38 = vmul.f32 %v1074_v17, %v1059_v34 }
 0x318   : > { %758 = vst.msk [vmem:[#allocation4 + $0x8] sm:$0xff] %vm332_vm0, %v753_v16 }
 0x31d   : > { %v1069_v29 = vpop.permute.xlu0 %1068 }
 0x31e   : > { %v1082_v33 = vmul.f32 %v1069_v29, %v1058_v28 }
 0x346   : > { %v748_v20 = vpop.xlane.xlu1 %747 }
 0x347   : > { %v754_v22 = vadd.f32 %v748_v20, %v738_v19 }
 0x349   : > { %759 = vst.msk [vmem:[#allocation4 + $0x10] sm:$0xff] %vm332_vm0, %v754_v22 }
 0x34a   : > { %v751_v24 = vpop.xlane.xlu1 %750 }
 0x34b   : > { %v755_v25 = vadd.f32 %v751_v24, %v739_v23 }
 0x34d   : > { %760 = vst.msk [vmem:[#allocation4 + $0x18] sm:$0xff] %vm332_vm0, %v755_v25 }
 0x34e   : > { %v1079_v40 = vpop.permute.xlu1 %1078 }
 0x34f   : > { %v1084_v44 = vmul.f32 %v1079_v40, %v1060_v39 }
 0x356   : > { %v834_v30 = vpop.f32.mrb[4].mxu0 }
 0x357   : > { %v1085_v31 = vadd.f32 %v1081_v27, %v834_v30  ;;  %v1446_v32 = vpop.f32.mrb[5].mxu0 }
 0x359   : > { %1089 = vst.msk [vmem:[#allocation5] sm:$0xff] %vm341_vm1, %v1085_v31 }
 0x35a   : > { %v907_v35 = vpop.f32.mrb[4].mxu1 }
 0x35b   : > { %v1086_v36 = vadd.f32 %v1082_v33, %v907_v35  ;;  %v1451_v37 = vpop.f32.mrb[5].mxu1 }
 0x35d   : > { %1090 = vst.msk [vmem:[#allocation5 + $0x8] sm:$0xff] %vm341_vm1, %v1086_v36 }
 0x35e   : > { %v980_v41 = vpop.f32.mrb[6].mxu0 }
 0x35f   : > { %v1087_v42 = vadd.f32 %v1083_v38, %v980_v41  ;;  %v1456_v43 = vpop.f32.mrb[7].mxu0 }
 0x361   : > { %1091 = vst.msk [vmem:[#allocation5 + $0x10] sm:$0xff] %vm341_vm1, %v1087_v42 }
 0x362   : > { %v1053_v45 = vpop.f32.mrb[6].mxu1 }
 0x363   : > { %v1088_v46 = vadd.f32 %v1084_v44, %v1053_v45  ;;  %v1461_v47 = vpop.f32.mrb[7].mxu1 }
 0x365   : > { %1092 = vst.msk [vmem:[#allocation5 + $0x18] sm:$0xff] %vm341_vm1, %v1088_v46 }
 0x366 PF: > { %p1396_p13 = scmp.eq.s32.totalorder %s2047_s29, 0 }
 0x367   : > { %v1100_v48 = vld [vmem:[%s2070_s30] sm:$0xff] (!%p1396_p13)  ;;  %v1101_v49 = vld [vmem:[%s2070_s30 + $0x8] sm:$0xff] (!%p1396_p13)  ;;  %v1102_v52 = vld [vmem:[%s2070_s30 + $0x10] sm:$0xff] (!%p1396_p13) }
 0x368   : > { %1099 = sbr.rel (%p1396_p13) target bundleno = 889 (0x379), region = 56  ;;  %v1105_v50 = vsel (!%p1396_p13), %vm341_vm1, %v1100_v48, 0.0  ;;  %v1112_v51 = vsel (!%p1396_p13), %vm341_vm1, %v1101_v49, 0.0  ;;  %v1119_v55 = vsel (!%p1396_p13), %vm341_vm1, %v1102_v52, 0.0  ;;  %v1103_v56 = vld [vmem:[%s2070_s30 + $0x18] sm:$0xff] (!%p1396_p13)  ;;  %v1145_v57 = vld [vmem:[#allocation4] sm:$0xff] (!%p1396_p13) }
 0x369   : > { %v1106_v53 = vrot.slane (!%p1396_p13), %v1105_v50, 4  ;;  %v1113_v54 = vrot.slane (!%p1396_p13), %v1112_v51, 4  ;;  %v1120_v58 = vrot.slane (!%p1396_p13), %v1119_v55, 4  ;;  %v1126_v59 = vsel (!%p1396_p13), %vm341_vm1, %v1103_v56, 0.0  ;;  %v1146_v61 = vld [vmem:[#allocation4 + $0x8] sm:$0xff] (!%p1396_p13)  ;;  %v1147_v62 = vld [vmem:[#allocation4 + $0x10] sm:$0xff] (!%p1396_p13) }
 0x36a   : > { %v1149_v60 = vadd.f32 (!%p1396_p13), 8.0, %v1145_v57  ;;  %v1148_v63 = vld [vmem:[#allocation4 + $0x18] sm:$0xff] (!%p1396_p13)  ;;  %v1127_v2 = vrot.slane (!%p1396_p13), %v1126_v59, 4  ;;  %v1150_v3 = vadd.f32 (!%p1396_p13), 8.0, %v1146_v61  ;;  %v1151_v5 = vadd.f32 (!%p1396_p13), 8.0, %v1147_v62  ;;  %v1133_v18 = vld [vmem:[#allocation5] sm:$0xff] (!%p1396_p13) }
 0x36b   : > { %v1107_v0 = vadd.f32 (!%p1396_p13), %v1106_v53, %v1105_v50  ;;  %v1114_v1 = vadd.f32 (!%p1396_p13), %v1113_v54, %v1112_v51  ;;  %v1121_v4 = vadd.f32 (!%p1396_p13), %v1120_v58, %v1119_v55  ;;  %v1152_v6 = vadd.f32 (!%p1396_p13), 8.0, %v1148_v63  ;;  %v1134_v19 = vld [vmem:[#allocation5 + $0x8] sm:$0xff] (!%p1396_p13)  ;;  %v1135_v23 = vld [vmem:[#allocation5 + $0x10] sm:$0xff] (!%p1396_p13) }
 0x36c   : > { %1154 = vst.msk [vmem:[#allocation4] sm:$0xff] (!%p1396_p13), %vm332_vm0, %v1149_v60  ;;  %v1128_v9 = vadd.f32 (!%p1396_p13), %v1127_v2, %v1126_v59  ;;  %1155 = vst.msk [vmem:[#allocation4 + $0x8] sm:$0xff] (!%p1396_p13), %vm332_vm0, %v1150_v3  ;;  %v1136_v26 = vld [vmem:[#allocation5 + $0x18] sm:$0xff] (!%p1396_p13) }
 0x36d   : > { %v1108_v7 = vrot.slane (!%p1396_p13), %v1107_v0, 2  ;;  %v1115_v8 = vrot.slane (!%p1396_p13), %v1114_v1, 2  ;;  %v1122_v10 = vrot.slane (!%p1396_p13), %v1121_v4, 2  ;;  %1156 = vst.msk [vmem:[#allocation4 + $0x10] sm:$0xff] (!%p1396_p13), %vm332_vm0, %v1151_v5  ;;  %1157 = vst.msk [vmem:[#allocation4 + $0x18] sm:$0xff] (!%p1396_p13), %vm332_vm0, %v1152_v6 }
 0x36e   : > { %v1129_v13 = vrot.slane (!%p1396_p13), %v1128_v9, 2 }
 0x36f   : > { %v1109_v11 = vadd.f32 %v1108_v7, %v1107_v0  ;;  %v1116_v12 = vadd.f32 %v1115_v8, %v1114_v1  ;;  %v1123_v14 = vadd.f32 %v1122_v10, %v1121_v4 }
 0x370   : > { %v1130_v17 = vadd.f32 %v1129_v13, %v1128_v9 }
 0x371   : > { %v1110_v15 = vrot.slane %v1109_v11, 1  ;;  %v1117_v16 = vrot.slane %v1116_v12, 1  ;;  %v1124_v20 = vrot.slane %v1123_v14, 1 }
 0x372   : > { %v1131_v24 = vrot.slane %v1130_v17, 1 }
 0x373   : > { %v1111_v21 = vadd.f32 %v1110_v15, %v1109_v11  ;;  %v1118_v22 = vadd.f32 %v1117_v16, %v1116_v12  ;;  %v1125_v25 = vadd.f32 %v1124_v20, %v1123_v14 }
 0x374   : > { %v1132_v29 = vadd.f32 %v1131_v24, %v1130_v17 }
 0x375   : > { %v1137_v27 = vadd.f32 %v1133_v18, %v1111_v21  ;;  %v1138_v28 = vadd.f32 %v1134_v19, %v1118_v22  ;;  %v1139_v30 = vadd.f32 %v1135_v23, %v1125_v25 }
 0x376   : > { %v1140_v31 = vadd.f32 %v1136_v26, %v1132_v29 }
 0x377   : > { %1141 = vst.msk [vmem:[#allocation5] sm:$0xff] %vm341_vm1, %v1137_v27  ;;  %1142 = vst.msk [vmem:[#allocation5 + $0x8] sm:$0xff] %vm341_vm1, %v1138_v28 }
 0x378   : > { %1143 = vst.msk [vmem:[#allocation5 + $0x10] sm:$0xff] %vm341_vm1, %v1139_v30  ;;  %1144 = vst.msk [vmem:[#allocation5 + $0x18] sm:$0xff] %vm341_vm1, %v1140_v31 }
 0x379 PF: > { %v1774_v34 = vmov 0   ;;  %s1405_s6 = sshll.u32 %s1753_s28, 9  ;;  %s1219_s18 = sshll.u32 %s2073_s10, 4  ;;  %s2168_s18 = int_to_ptr.vmem [resolvable:$true] %s1219_s18 }
 0x37a   : > { %1564 = vset.pattern.permute.xlu1 %v1774_v34  ;;  %1563 = vset.pattern.permute.xlu0 %v1774_v34  ;;  %s2166_s19 = scalar_lea.hbm %s2225_s4, %s1405_s6  ;;  %s1203_s28 = scalar_lea.sflag [#allocation10], %s2025_s7 }
 0x37b   : > { %s1673_s21 = scalar_lea.vmem %s2168_s18, 512  ;;  %p2254_p12 = scmp.ne.s32.totalorder %s2240_s11, 0 }
 0x37c   : > { %p1674_p11 = scmp.ne.s32.totalorder %s2168_s18, %s1673_s21  ;;  %s1775_s12 = smov [#allocation14]  }
 0x37d   : > { %v1165_v33 = vld [vmem:[#allocation4] sm:$0xff]  ;;  %v1166_v36 = vld [vmem:[#allocation4 + $0x8] sm:$0xff]  ;;  %s1677_s2 = sshll.u32 %s1775_s12, 4  ;;  %s1678_s2 = int_to_ptr.vmem [resolvable:$false] %s1677_s2 }
 0x37e   : > { %v1167_v32 = vld [vmem:[#allocation4 + $0x10] sm:$0xff]  ;;  %1171 = vperm.xlu0 %1563, %v1165_v33   ;;  %v1168_v35 = vld [vmem:[#allocation4 + $0x18] sm:$0xff]  ;;  %v1161_v42 = vld [vmem:[#allocation5] sm:$0xff]  ;;  %p1675_p1 = pnand %p1674_p11, %p2254_p12  ;;  %s1679_s14 = scalar_lea.vmem %s1678_s2, 1024 }
 0x37f   : > { %1181 = vperm.xlu1 %1564, %v1167_v32   ;;  %v1163_v41 = vld [vmem:[#allocation5 + $0x10] sm:$0xff]  ;;  %v1164_v47 = vld [vmem:[#allocation5 + $0x18] sm:$0xff]  ;;  %v1162_v48 = vld [vmem:[#allocation5 + $0x8] sm:$0xff]  ;;  %p1680_p9 = scmp.lt.s32.totalorder %s2168_s18, %s1678_s2  ;;  %p1681_p2 = scmp.lt.s32.totalorder %s1679_s14, %s1673_s21 }
 0x380   : > { %p1676_p4 = pneg %p1675_p1 }
 0x381   : > { %p1682_p0 = por %p1681_p2, %p1680_p9 }
 0x382   : > { %1176 = vperm.xlu0 %1563, %v1166_v36  }
 0x383   : > { %1186 = vperm.xlu1 %1564, %v1168_v35   ;;  %p1683_p5 = pnand %p1682_p0, %p1676_p4 }
 0x3fd   : > { %v1172_v38 = vpop.permute.xlu0 %1171 }
 0x3fe   : > { %v1182_v37 = vpop.permute.xlu1 %1181 }
 0x3ff   : > { %1565 = vrcp.f32 %v1182_v37 }
 0x400   : > { %1567 = vrcp.f32 %v1172_v38 }
 0x401   : > { %v1177_v40 = vpop.permute.xlu0 %1176 }
 0x402   : > { %v1187_v39 = vpop.permute.xlu1 %1186 }
 0x403   : > { %1569 = vrcp.f32 %v1187_v39 }
 0x404   : > { %1571 = vrcp.f32 %v1177_v40 }
 0x409   : > { %v1566_v43 = vpop.eup %1565 }
 0x40a   : > { %v1568_v44 = vpop.eup %1567  ;;  %v1194_v45 = vmul.f32 %v1566_v43, %v1163_v41 }
 0x40b   : > { %v1190_v46 = vmul.f32 %v1568_v44, %v1161_v42 }
 0x40c   : > { %1200 = vst.msk [vmem:[%s2073_s10 + $0x10] sm:$0xff] %vm341_vm1, %v1194_v45 }
 0x40d   : > { %v1570_v49 = vpop.eup %1569  ;;  %1198 = vst.msk [vmem:[%s2073_s10] sm:$0xff] %vm341_vm1, %v1190_v46 }
 0x40e   : > { %v1572_v50 = vpop.eup %1571  ;;  %v1196_v51 = vmul.f32 %v1570_v49, %v1164_v47 }
 0x40f   : > { %v1192_v52 = vmul.f32 %v1572_v50, %v1162_v48 }
 0x410   : > { %1201 = vst.msk [vmem:[%s2073_s10 + $0x18] sm:$0xff] %vm341_vm1, %v1196_v51 }
 0x411   : > { %1199 = vst.msk [vmem:[%s2073_s10 + $0x8] sm:$0xff] %vm341_vm1, %v1192_v52 }
 0x412   : > { %1686 = shalt.err (!%p1683_p5)
}
 0x413   : > { %s1687_s15 = scalar_lea.hbm %s2166_s19, 512  ;;  %s1691_s17 = scalar_lea.hbm %s2225_s4, 1024 }
 0x414   : > { %p1688_p8 = scmp.ne.s32.totalorder %s2166_s19, %s1687_s15  ;;  %p1692_p6 = scmp.lt.u32.totalorder %s2166_s19, %s2225_s4 }
 0x415   : > { %p1693_p3 = scmp.lt.u32.totalorder %s1691_s17, %s1687_s15  ;;  %p1695_p11 = scmp.lt.u32.totalorder %s1687_s15, %s2166_s19 }
 0x416   : > { %p1689_p10 = pnand %p1688_p8, %p2254_p12 }
 0x417   : > { %p1694_p13 = por %p1693_p3, %p1692_p6 }
 0x418   : > { %p1690_p7 = pneg %p1689_p10 }
 0x419   : > { %p1696_p1 = por %p1695_p11, %p1694_p13 }
 0x41b   : > { %p1697_p4 = pnand %p1696_p1, %p1690_p7 }
 0x41d   : > { %1700 = shalt.err (!%p1697_p4)
}
 0x41e   : > { %s1776_s5 = smov 128   ;;  %s1777_s22 = smov 8  }
 0x41f   : > { %1468 = dma.vmem_to_hbm [thread:$0]  (%p2254_p12), %s2168_s18, 512, %s2166_s19, %s1203_s28, %s1776_s5, %s1776_s5, %s1777_s22  }
 0x420 PF: > { %s1234_s29 = sand.u32 1, %s1741_s25   ;;  %p2255_p9 = scmp.ne.s32.totalorder %s2242_s13, 0 }
 0x421   : > { %p2256_p2 = scmp.ge.s32.totalorder %s1761_s0, 2  ;;  %s1235_s30 = scalar_lea.sflag [#allocation10], %s1234_s29 }
 0x423   : > { %p1481_p0 = pnand %p2256_p2, %p2255_p9 }
 0x425   : > { %1736 = dma.done.wait (!%p1481_p0), %s1235_s30, 512  }
 0x426   : > { %1738 = vsyncadd (!%p1481_p0), %s1235_s30, 4294966784  ;;  %s27_s0 = sadd.s32 1, %s1761_s0   ;;  %s2257_s10 = sld [smem:[#allocation21_spill]] }
 0x427   : > { %p24_p5 = scmp.ge.s32.totalorder %s27_s0, 4   ;;  %s2258_s28 = sld [smem:[#allocation19_spill]] }
 0x428   : > { %s2259_s29 = sld [smem:[#allocation20_spill]]  ;;  %s2260_s25 = smov %s1745_s26 }
 0x429   : > { %s2261_s26 = smov %s1749_s27  ;;  %26 = sbr.rel (!%p24_p5) target bundleno = 20 (0x14), region = 117 }
 0x42c   : > { %s2262_s27 = smov %s2257_s10 }
 0x430   :  { %1240 = vsyncpa [#allocation9], 1 }
 0x431   :  { %1242 = vsyncpa [#allocation9 + $0x1], 1 }
 0x432   :  { %1243 = vsyncpa [#allocation12], 1 }
 0x433   :  { %1245 = vsyncpa [#allocation12 + $0x1], 1 }
 0x434   :  { %1246 = vsyncpa [#allocation10], 1 }
 0x435   :  { %1248 = vsyncpa [#allocation10 + $0x1], 1 }

</bundles_post_ra>
